<compile_context>
chip_gen: v7x
topology: tpu7x:2x2x1
jax: 0.10.0
libtpu: 0.0.40
codegen_flags: <defaults>
</compile_context>

<pallas_src>
import jax
import jax.numpy as jnp
from jax import lax
from jax.experimental import pallas as pl
from jax.experimental.pallas import tpu as pltpu

IN_F = 131
HID = 20
OUT = 2

_LANE = 128
_MAX_TB = 1024  # rows per batch tile; bf16 x tile ≈ TB*0.5 KiB (131 pads to 256 lanes),
                # double-buffered ≈ 1 MiB at TB=1024 -> safe on v7x's 32 MiB scoped VMEM


def _mlp_kernel(x_ref, w1_ref, b1_ref, wd_ref, bd_ref, o_ref):
    # x_ref : (TB, IN_F)  bf16      w1_ref: (IN_F, HID) bf16
    # b1_ref: (1, HID)    f32       wd_ref: (1, HID)    f32   bd_ref: (1, 1) f32
    # o_ref : (OUT, TB)   f32  -- transposed output, batch on the lane axis
    h = jnp.dot(x_ref[...], w1_ref[...], preferred_element_type=jnp.float32)
    h = jnp.tanh(h + b1_ref[...])                      # (TB, HID), f32

    # 2-class closed form, computed transposed so the store is lane dense:
    #   d(1,TB) = wd(1,HID) . h(TB,HID)^T + bd
    d = lax.dot_general(
        wd_ref[...], h,
        dimension_numbers=(((1,), (1,)), ((), ())),
        preferred_element_type=jnp.float32,
    ) + bd_ref[...]                                    # (1, TB)

    # softplus(z) = max(z,0) + log(1 + exp(-|z|)); the log term is shared by +d/-d.
    t = jnp.log(1.0 + jnp.exp(-jnp.abs(d)))
    o_ref[0:1, :] = (-(jnp.maximum(d, 0.0) + t)).astype(o_ref.dtype)   # log p(class 0)
    o_ref[1:2, :] = (-(jnp.maximum(-d, 0.0) + t)).astype(o_ref.dtype)  # log p(class 1)


@jax.jit
def mlp_forward(x, w1, b1, w2, b2):
    """x: (B, IN_F) f32, w1: (IN_F, HID), b1: (1, HID), w2: (HID, OUT), b2: (1, OUT)."""
    B = x.shape[0]
    b1 = b1.reshape(1, HID).astype(jnp.float32)
    w2 = w2.reshape(HID, OUT).astype(jnp.float32)
    b2 = b2.reshape(OUT).astype(jnp.float32)

    # Precompute the 2-class difference weights for the closed-form log-softmax.
    wd = (w2[:, 1] - w2[:, 0]).reshape(1, HID)
    bd = (b2[1] - b2[0]).reshape(1, 1)

    # bf16 only on the MXU operands (the HBM-bound x stream); everything after is f32.
    x_bf = x.astype(jnp.bfloat16)
    w1_bf = w1.astype(jnp.bfloat16)

    # Batch tiling; TB must be a multiple of 128 for the lane-dense (OUT, TB) output.
    tb = min(_MAX_TB, ((B + _LANE - 1) // _LANE) * _LANE)
    n_tiles = (B + tb - 1) // tb
    b_pad = n_tiles * tb
    if b_pad != B:
        x_bf = jnp.pad(x_bf, ((0, b_pad - B), (0, 0)))

    cost = pl.CostEstimate(
        flops=2 * b_pad * IN_F * HID + 2 * b_pad * HID,
        transcendentals=b_pad * HID + 2 * b_pad,          # tanh + softplus exp/log
        bytes_accessed=b_pad * IN_F * 2                   # x (bf16) -- dominant stream
        + IN_F * HID * 2 + (2 * HID + 1) * 4              # weights/biases
        + OUT * b_pad * 4,                                # output
    )

    out_t = pl.pallas_call(
        _mlp_kernel,
        out_shape=jax.ShapeDtypeStruct((OUT, b_pad), jnp.float32),
        grid_spec=pltpu.PrefetchScalarGridSpec(
            num_scalar_prefetch=0,
            grid=(n_tiles,),
            in_specs=[
                pl.BlockSpec((tb, IN_F), lambda i: (i, 0)),   # x: streamed per tile
                pl.BlockSpec((IN_F, HID), lambda i: (0, 0)),  # w1: resident
                pl.BlockSpec((1, HID), lambda i: (0, 0)),     # b1: resident
                pl.BlockSpec((1, HID), lambda i: (0, 0)),     # wd: resident
                pl.BlockSpec((1, 1), lambda i: (0, 0)),       # bd: resident
            ],
            out_specs=pl.BlockSpec((OUT, tb), lambda i: (0, i)),
        ),
        compiler_params=pltpu.CompilerParams(
            dimension_semantics=("parallel",),                # megacore on v7x
            vmem_limit_bytes=32 * 1024 * 1024,                # explicit, portable budget
        ),
        cost_estimate=cost,
    )(x_bf, w1_bf, b1, wd, bd)

    # Back to PyTorch layout: (B, 2) log-probabilities.
    return out_t[:, :B].T


def init_params(key):
    """Deterministic init mimicking PyTorch nn.Linear (uniform ±1/sqrt(fan_in))."""
    k1, k2, k3, k4 = jax.random.split(key, 4)
    bound1 = 1.0 / jnp.sqrt(jnp.float32(IN_F))
    bound2 = 1.0 / jnp.sqrt(jnp.float32(HID))
    w1 = jax.random.uniform(k1, (IN_F, HID), jnp.float32, -bound1, bound1)
    b1 = jax.random.uniform(k2, (1, HID), jnp.float32, -bound1, bound1)
    w2 = jax.random.uniform(k3, (HID, OUT), jnp.float32, -bound2, bound2)
    b2 = jax.random.uniform(k4, (1, OUT), jnp.float32, -bound2, bound2)
    return w1, b1, w2, b2


if __name__ == "__main__":
    key = jax.random.PRNGKey(0)
    k_x, k_p = jax.random.split(key)

    B = 8  # small demo batch (kernel pads to one 128-row tile internally)
    x = jax.random.normal(k_x, (B, IN_F), jnp.float32)
    w1, b1, w2, b2 = init_params(k_p)

    out = mlp_forward(x, w1, b1, w2, b2)
    jax.block_until_ready(out)

    # Sanity check vs. pure-JAX f32 reference (kernel uses bf16 MXU operands,
    # so allow a correspondingly loose tolerance).
    ref = jax.nn.log_softmax(jnp.tanh(x @ w1 + b1) @ w2 + b2, axis=-1)
    assert out.shape == (B, OUT)
    assert jnp.allclose(out, ref, atol=2e-2, rtol=2e-2), "mismatch vs reference"

    print("KERNEL_OK")
</pallas_src>

<mosaic_0001>
module attributes {stable_mosaic.version = 11 : i64} {
  func.func @_mlp_kernel(%arg0: i32, %arg1: memref<128x131xbf16, #tpu.memory_space<vmem>>, %arg2: memref<131x20xbf16, #tpu.memory_space<vmem>>, %arg3: memref<1x20xf32, #tpu.memory_space<vmem>>, %arg4: memref<1x20xf32, #tpu.memory_space<vmem>>, %arg5: memref<1x1xf32, #tpu.memory_space<vmem>>, %arg6: memref<2x128xf32, #tpu.memory_space<vmem>>) attributes {dimension_semantics = [#tpu.dimension_semantics<parallel>], iteration_bounds = array<i64: 1>, scalar_prefetch = 0 : i64, scratch_operands = 0 : i64, tpu.core_type = #tpu.core_type<tc>, window_params = [{transform_indices = @transform_0, window_bounds = array<i64: 128, 131>}, {pipeline_mode = #tpu.pipeline_mode<synchronous>, transform_indices = @transform_1, window_bounds = array<i64: 131, 20>}, {pipeline_mode = #tpu.pipeline_mode<synchronous>, transform_indices = @transform_2, window_bounds = array<i64: 1, 20>}, {pipeline_mode = #tpu.pipeline_mode<synchronous>, transform_indices = @transform_3, window_bounds = array<i64: 1, 20>}, {pipeline_mode = #tpu.pipeline_mode<synchronous>, transform_indices = @transform_4, window_bounds = array<i64: 1, 1>}, {transform_indices = @transform_5, window_bounds = array<i64: 2, 128>}]} {
    %c0 = arith.constant 0 : index
    %c0_0 = arith.constant 0 : index
    %0 = vector.load %arg1[%c0, %c0_0] : memref<128x131xbf16, #tpu.memory_space<vmem>>, vector<128x131xbf16>
    %c0_1 = arith.constant 0 : index
    %c0_2 = arith.constant 0 : index
    %1 = vector.load %arg2[%c0_1, %c0_2] : memref<131x20xbf16, #tpu.memory_space<vmem>>, vector<131x20xbf16>
    %cst = arith.constant dense<0.000000e+00> : vector<128x20xf32>
    %2 = tpu.matmul %0, %1, %cst {dimension_numbers = #tpu.dot_dimension_numbers<[1], [0], [0], [1], [0, 0, 1, 1], [], []>} : vector<128x131xbf16>, vector<131x20xbf16>, vector<128x20xf32> -> vector<128x20xf32>
    %c0_3 = arith.constant 0 : index
    %c0_4 = arith.constant 0 : index
    %3 = vector.load %arg3[%c0_3, %c0_4] : memref<1x20xf32, #tpu.memory_space<vmem>>, vector<1x20xf32>
    %4 = vector.broadcast %3 : vector<1x20xf32> to vector<128x20xf32>
    %5 = arith.addf %2, %4 : vector<128x20xf32>
    %6 = math.tanh %5 : vector<128x20xf32>
    %c0_5 = arith.constant 0 : index
    %c0_6 = arith.constant 0 : index
    %7 = vector.load %arg4[%c0_5, %c0_6] : memref<1x20xf32, #tpu.memory_space<vmem>>, vector<1x20xf32>
    %cst_7 = arith.constant dense<0.000000e+00> : vector<1x128xf32>
    %8 = tpu.matmul %7, %6, %cst_7 {dimension_numbers = #tpu.dot_dimension_numbers<[1], [1], [0], [0], [0, 0, 1, 0], [], []>} : vector<1x20xf32>, vector<128x20xf32>, vector<1x128xf32> -> vector<1x128xf32>
    %c0_8 = arith.constant 0 : index
    %c0_9 = arith.constant 0 : index
    %9 = vector.load %arg5[%c0_8, %c0_9] : memref<1x1xf32, #tpu.memory_space<vmem>>, vector<1x1xf32>
    %10 = vector.broadcast %9 : vector<1x1xf32> to vector<1x128xf32>
    %11 = arith.addf %8, %10 : vector<1x128xf32>
    %12 = math.absf %11 : vector<1x128xf32>
    %cst_10 = arith.constant 0.000000e+00 : f32
    %13 = vector.broadcast %cst_10 : f32 to vector<1x128xf32>
    %14 = arith.subf %13, %12 : vector<1x128xf32>
    %15 = math.exp %14 : vector<1x128xf32>
    %cst_11 = arith.constant 1.000000e+00 : f32
    %16 = vector.broadcast %cst_11 : f32 to vector<1x128xf32>
    %17 = arith.addf %16, %15 : vector<1x128xf32>
    %18 = math.log %17 : vector<1x128xf32>
    %cst_12 = arith.constant 0.000000e+00 : f32
    %19 = vector.broadcast %cst_12 : f32 to vector<1x128xf32>
    %20 = arith.maximumf %11, %19 : vector<1x128xf32>
    %21 = arith.addf %20, %18 : vector<1x128xf32>
    %cst_13 = arith.constant 0.000000e+00 : f32
    %22 = vector.broadcast %cst_13 : f32 to vector<1x128xf32>
    %23 = arith.subf %22, %21 : vector<1x128xf32>
    %c0_14 = arith.constant 0 : index
    %c0_15 = arith.constant 0 : index
    %24 = vector.load %arg6[%c0_14, %c0_15] : memref<2x128xf32, #tpu.memory_space<vmem>>, vector<1x128xf32>
    tpu.vector_store %arg6[%c0_14, %c0_15], %23 {strides = array<i32>} : memref<2x128xf32, #tpu.memory_space<vmem>>, vector<1x128xf32>,
    %cst_16 = arith.constant 0.000000e+00 : f32
    %25 = vector.broadcast %cst_16 : f32 to vector<1x128xf32>
    %26 = arith.subf %25, %11 : vector<1x128xf32>
    %cst_17 = arith.constant 0.000000e+00 : f32
    %27 = vector.broadcast %cst_17 : f32 to vector<1x128xf32>
    %28 = arith.maximumf %26, %27 : vector<1x128xf32>
    %29 = arith.addf %28, %18 : vector<1x128xf32>
    %cst_18 = arith.constant 0.000000e+00 : f32
    %30 = vector.broadcast %cst_18 : f32 to vector<1x128xf32>
    %31 = arith.subf %30, %29 : vector<1x128xf32>
    %c1 = arith.constant 1 : index
    %c0_19 = arith.constant 0 : index
    %32 = vector.load %arg6[%c1, %c0_19] : memref<2x128xf32, #tpu.memory_space<vmem>>, vector<1x128xf32>
    tpu.vector_store %arg6[%c1, %c0_19], %31 {strides = array<i32>} : memref<2x128xf32, #tpu.memory_space<vmem>>, vector<1x128xf32>,
    return
  }
  func.func @transform_0(%arg0: i32) -> (i32, i32) {
    %c0_i32 = arith.constant 0 : i32
    %c0_i32_0 = arith.constant 0 : i32
    return %arg0, %c0_i32 : i32, i32
  }
  func.func @transform_1(%arg0: i32) -> (i32, i32) {
    %c0_i32 = arith.constant 0 : i32
    %c0_i32_0 = arith.constant 0 : i32
    %c0_i32_1 = arith.constant 0 : i32
    return %c0_i32, %c0_i32_0 : i32, i32
  }
  func.func @transform_2(%arg0: i32) -> (i32, i32) {
    %c0_i32 = arith.constant 0 : i32
    %c0_i32_0 = arith.constant 0 : i32
    %c0_i32_1 = arith.constant 0 : i32
    return %c0_i32, %c0_i32_0 : i32, i32
  }
  func.func @transform_3(%arg0: i32) -> (i32, i32) {
    %c0_i32 = arith.constant 0 : i32
    %c0_i32_0 = arith.constant 0 : i32
    %c0_i32_1 = arith.constant 0 : i32
    return %c0_i32, %c0_i32_0 : i32, i32
  }
  func.func @transform_4(%arg0: i32) -> (i32, i32) {
    %c0_i32 = arith.constant 0 : i32
    %c0_i32_0 = arith.constant 0 : i32
    %c0_i32_1 = arith.constant 0 : i32
    return %c0_i32, %c0_i32_0 : i32, i32
  }
  func.func @transform_5(%arg0: i32) -> (i32, i32) {
    %c0_i32 = arith.constant 0 : i32
    %c0_i32_0 = arith.constant 0 : i32
    return %c0_i32, %arg0 : i32, i32
  }
}

</mosaic_0001>

<bundles_post_ra>
// kernel: mlp_forward.1
= control target key start
LH: loop header
LB: loop body
LE: loop exit
PB: predicated region body
PF: predicated region fallthrough
CT: control target
= control target key end

     0   :  { %v694_v0 = vmov 0   ;;  %vm186_vm0 = vcmask 23552   ;;  %vm211_vm1 = vcmask 1040384   ;;  %vm212_vm2 = vcmask 1041408   ;;  %s876_s1 = inlined_call_operand.vmem [shape: bf16[131,20], index: 1, kind: input, shape index: {}]   ;;  %s877_s0 = inlined_call_operand.vmem [shape: bf16[128,131], index: 0, kind: input, shape index: {}]   ;;  %s878_s4 = inlined_call_operand.<no memory space> [shape: f32[1,1], index: 4, kind: input, shape index: {}]   ;;  %s879_s2 = inlined_call_operand.vmem [shape: f32[1,20], index: 2, kind: input, shape index: {}]   ;;  %s880_s3 = inlined_call_operand.vmem [shape: f32[1,20], index: 3, kind: input, shape index: {}]   ;;  %s881_s5 = inlined_call_operand.vmem [shape: f32[2,128], index: 5, kind: output, shape index: {}]  }
   0x1   :  { %218 = vmatprep.subr.bf16.mxu0 %v694_v0  ;;  %v625_v1 = vld [vmem:[%s876_s1] sm:$0xff]   ;;  %624 = vset.pattern.permute.xlu0 %v694_v0  ;;  %v626_v2 = vld [vmem:[%s876_s1 + $0x8] sm:$0xff]   ;;  %v627_v3 = vld [vmem:[%s876_s1 + $0x10] sm:$0xff]   ;;  %v695_v9 = vmov 65535   ;;  %v696_v30 = vmov 0.0|0.0   ;;  %vm697_vm3 = vmmov 0   ;;  %v10_v32 = vstv %s878_s4 }
   0x2   :  { %219 = vmatpush1.bf16.msra.mxu0 %v625_v1  ;;  %v636_v4 = vld [vmem:[%s877_s0 + $0x4] ss:$8 sps:$4 sm:$0xff]   ;;  %v628_v5 = vld [vmem:[%s876_s1 + $0x18] sm:$0xff]   ;;  %v631_v8 = vld [vmem:[%s876_s1 + $0x30] sm:$0xff]   ;;  %v213_v10 = vsel %vm211_vm1, 4294967295, %v695_v9  ;;  %587 = vmatprep.subr.bf16.mxu1 %v696_v30  ;;  %v698_v31 = vmov 0.0  }
   0x3   :  { %220 = vmatprep.subr.bf16.mxu0 %v694_v0  ;;  %510 = vmatprep.mubr.msk.bf16.mxu0 %vm186_vm0, %v636_v4  ;;  %v629_v6 = vld [vmem:[%s876_s1 + $0x20] sm:$0xff]   ;;  %v630_v7 = vld [vmem:[%s876_s1 + $0x28] sm:$0xff]   ;;  %v632_v11 = vld [vmem:[%s876_s1 + $0x38] sm:$0xff]   ;;  %v214_v13 = vsel %vm212_vm2, %v213_v10, 0  ;;  %11 = vst [vmem:[#allocation2] sm:$0x1] %v10_v32 }
   0x4   :  { %v633_v12 = vld [vmem:[%s876_s1 + $0x40] ss:$0 sps:$4 sm:$0x33]   ;;  %v637_v16 = vld [vmem:[%s877_s0 + $0x14] ss:$8 sps:$4 sm:$0xff]   ;;  %584 = vmatprep.mubr.msk.f32.mxu1 %vm697_vm3, %v698_v31  ;;  %vm342_vm4 = vcmask 162816  }
   0x5   :  { %v216_v14 = vand.u32 %v633_v12, %v214_v13  ;;  %v634_v15 = vld [vmem:[%s877_s0] ss:$8 sps:$4 sm:$0xff]   ;;  %v639_v17 = vld [vmem:[%s877_s0 + $0x10] ss:$8 sps:$4 sm:$0xff]   ;;  %v640_v18 = vld [vmem:[%s877_s0 + $0x24] ss:$8 sps:$4 sm:$0xff]  }
   0x6   :  { %221 = vmatpush1.bf16.msra.mxu0 %v626_v2  ;;  %v642_v19 = vld [vmem:[%s877_s0 + $0x20] ss:$8 sps:$4 sm:$0xff]   ;;  %v643_v20 = vld [vmem:[%s877_s0 + $0x34] ss:$8 sps:$4 sm:$0xff]   ;;  %v645_v21 = vld [vmem:[%s877_s0 + $0x30] ss:$8 sps:$4 sm:$0xff]  }
   0x7   :  { %222 = vmatprep.subr.bf16.mxu0 %v694_v0  ;;  %v646_v22 = vld [vmem:[%s877_s0 + $0x44] ss:$8 sps:$4 sm:$0xff]   ;;  %v648_v23 = vld [vmem:[%s877_s0 + $0x40] ss:$8 sps:$4 sm:$0xff]   ;;  %v649_v24 = vld [vmem:[%s877_s0 + $0x54] ss:$8 sps:$4 sm:$0xff]  }
   0x8   :  { %v651_v25 = vld [vmem:[%s877_s0 + $0x50] ss:$8 sps:$4 sm:$0xff]   ;;  %v652_v26 = vld [vmem:[%s877_s0 + $0x64] ss:$8 sps:$4 sm:$0xff]   ;;  %v654_v27 = vld [vmem:[%s877_s0 + $0x60] ss:$8 sps:$4 sm:$0xff]  }
   0x9   :  { %v655_v28 = vld [vmem:[%s877_s0 + $0x74] ss:$8 sps:$4 sm:$0xff]   ;;  %v657_v29 = vld [vmem:[%s877_s0 + $0x70] ss:$8 sps:$4 sm:$0xff]   ;;  %v819_v34 = vld [vmem:[%s879_s2] ss:$0 sm:$0xff] }
   0xa   :  { %223 = vmatpush1.bf16.msra.mxu0 %v627_v3  ;;  %v332_v33 = vld [vmem:[#allocation2] sm:$0x1]  ;;  %vm827_vm5 = vmpackc.low %vm342_vm4, %vm342_vm4 }
   0xb   :  { %224 = vmatprep.subr.bf16.mxu0 %v694_v0  ;;  %335 = vperm.xlu0 %624, %v332_v33  }
   0xe   :  { %225 = vmatpush1.bf16.msra.mxu0 %v628_v5 }
   0xf   :  { %226 = vmatprep.subr.bf16.mxu0 %v694_v0 }
  0x12   :  { %227 = vmatpush1.bf16.msra.mxu0 %v629_v6 }
  0x13   :  { %228 = vmatprep.subr.bf16.mxu0 %v694_v0 }
  0x16   :  { %229 = vmatpush1.bf16.msra.mxu0 %v630_v7 }
  0x17   :  { %230 = vmatprep.subr.bf16.mxu0 %v694_v0 }
  0x1a   :  { %231 = vmatpush1.bf16.msra.mxu0 %v631_v8 }
  0x1b   :  { %232 = vmatprep.subr.bf16.mxu0 %v694_v0 }
  0x1e   :  { %233 = vmatpush1.bf16.msra.mxu0 %v632_v11 }
  0x1f   :  { %234 = vmatprep.subr.bf16.mxu0 %v694_v0 }
  0x22   :  { %235 = vmatpush1.bf16.msra.mxu0 %v216_v14 }
  0x25   :  { %251 = vmatmul.mubr.bf16.vlgmr.msra.gmra.mrb[0].mxu0 %v634_v15 }
  0x26   :  { %511 = vmatprep.mubr.msk.bf16.mxu0 %vm186_vm0, %v637_v16 }
  0x2d   :  { %259 = vmatmul.mubr.bf16.gmra.mrb[4].mxu0 %v639_v17 }
  0x2e   :  { %512 = vmatprep.mubr.msk.bf16.mxu0 %vm186_vm0, %v640_v18 }
  0x35   :  { %267 = vmatmul.mubr.bf16.gmra.mrb[8].mxu0 %v642_v19 }
  0x36   :  { %513 = vmatprep.mubr.msk.bf16.mxu0 %vm186_vm0, %v643_v20 }
  0x3d   :  { %275 = vmatmul.mubr.bf16.gmra.mrb[12].mxu0 %v645_v21 }
  0x3e   :  { %514 = vmatprep.mubr.msk.bf16.mxu0 %vm186_vm0, %v646_v22 }
  0x45   :  { %283 = vmatmul.mubr.bf16.gmra.mrb[16].mxu0 %v648_v23 }
  0x46   :  { %515 = vmatprep.mubr.msk.bf16.mxu0 %vm186_vm0, %v649_v24 }
  0x4d   :  { %291 = vmatmul.mubr.bf16.gmra.mrb[20].mxu0 %v651_v25 }
  0x4e   :  { %516 = vmatprep.mubr.msk.bf16.mxu0 %vm186_vm0, %v652_v26 }
  0x55   :  { %299 = vmatmul.mubr.bf16.gmra.mrb[24].mxu0 %v654_v27 }
  0x56   :  { %517 = vmatprep.mubr.msk.bf16.mxu0 %vm186_vm0, %v655_v28 }
  0x5d   :  { %307 = vmatmul.mubr.bf16.gmra.mrb[28].mxu0 %v657_v29 }
  0xf8   :  { %v252_v35 = vpop.f32.mrb[0].mxu0 }
  0xf9   :  { %v253_v36 = vadd.f32 %v819_v34, %v252_v35  ;;  %v254_v37 = vpop.f32.mrb[1].mxu0 }
  0xfa   :  { %v255_v38 = vpop.f32.mrb[2].mxu0 }
  0xfb   :  { %v256_v39 = vadd.f32 %v819_v34, %v255_v38  ;;  %v257_v40 = vpop.f32.mrb[3].mxu0  ;;  %658 = vtanh.f32 %v253_v36 }
  0xfd   :  { %660 = vtanh.f32 %v256_v39 }
 0x100   :  { %v260_v41 = vpop.f32.mrb[4].mxu0 }
 0x101   :  { %v261_v42 = vadd.f32 %v819_v34, %v260_v41  ;;  %v262_v43 = vpop.f32.mrb[5].mxu0 }
 0x102   :  { %v263_v44 = vpop.f32.mrb[6].mxu0 }
 0x103   :  { %v264_v45 = vadd.f32 %v819_v34, %v263_v44  ;;  %v265_v46 = vpop.f32.mrb[7].mxu0  ;;  %662 = vtanh.f32 %v261_v42 }
 0x104   :  { %v338_v46 = vlaneseq }
 0x105   :  { %664 = vtanh.f32 %v264_v45  ;;  %v659_v47 = vpop.eup %658 }
 0x107   :  { %v661_v48 = vpop.eup %660 }
 0x108   :  { %v268_v50 = vpop.f32.mrb[8].mxu0  ;;  %v588_v51 = vpack.c.bf16 %v661_v48, %v659_v47  ;;  %v339_v47 = vshrl.u32 %v338_v46, 7 }
 0x109   :  { %v269_v52 = vadd.f32 %v819_v34, %v268_v50  ;;  %v270_v53 = vpop.f32.mrb[9].mxu0  ;;  %v336_v50 = vpop.permute.xlu0 %335 }
 0x10a   :  { %v271_v54 = vpop.f32.mrb[10].mxu0  ;;  %590 = vmatpush3.bf16.xpose.msk.msra.mxu1 %vm827_vm5, %v588_v51  ;;  %v340_v48 = vsub.s32 0, %v339_v47 }
 0x10b   :  { %v272_v55 = vadd.f32 %v819_v34, %v271_v54  ;;  %v273_v56 = vpop.f32.mrb[11].mxu0  ;;  %591 = vmatprep.subr.bf16.mxu1 %v696_v30  ;;  %666 = vtanh.f32 %v269_v52 }
 0x10c   :  { %v341_v51 = vrot.slane %v336_v50, %v340_v48 }
 0x10d   :  { %668 = vtanh.f32 %v272_v55  ;;  %v663_v57 = vpop.eup %662 }
 0x10f   :  { %v665_v58 = vpop.eup %664 }
 0x110   :  { %v276_v59 = vpop.f32.mrb[12].mxu0  ;;  %v592_v60 = vpack.c.bf16 %v665_v58, %v663_v57 }
 0x111   :  { %v277_v61 = vadd.f32 %v819_v34, %v276_v59  ;;  %v278_v62 = vpop.f32.mrb[13].mxu0 }
 0x112   :  { %v279_v63 = vpop.f32.mrb[14].mxu0  ;;  %594 = vmatpush3.bf16.xpose.msk.msra.mxu1 %vm827_vm5, %v592_v60 }
 0x113   :  { %v280_v0 = vadd.f32 %v819_v34, %v279_v63  ;;  %v281_v1 = vpop.f32.mrb[15].mxu0  ;;  %595 = vmatprep.subr.bf16.mxu1 %v696_v30  ;;  %670 = vtanh.f32 %v277_v61 }
 0x115   :  { %672 = vtanh.f32 %v280_v0  ;;  %v667_v2 = vpop.eup %666 }
 0x117   :  { %v669_v3 = vpop.eup %668 }
 0x118   :  { %v284_v4 = vpop.f32.mrb[16].mxu0  ;;  %v596_v5 = vpack.c.bf16 %v669_v3, %v667_v2 }
 0x119   :  { %v285_v6 = vadd.f32 %v819_v34, %v284_v4  ;;  %v286_v7 = vpop.f32.mrb[17].mxu0 }
 0x11a   :  { %v287_v8 = vpop.f32.mrb[18].mxu0  ;;  %598 = vmatpush3.bf16.xpose.msk.msra.mxu1 %vm827_vm5, %v596_v5 }
 0x11b   :  { %v288_v9 = vadd.f32 %v819_v34, %v287_v8  ;;  %v289_v10 = vpop.f32.mrb[19].mxu0  ;;  %599 = vmatprep.subr.bf16.mxu1 %v696_v30  ;;  %674 = vtanh.f32 %v285_v6 }
 0x11d   :  { %676 = vtanh.f32 %v288_v9  ;;  %v671_v11 = vpop.eup %670 }
 0x11f   :  { %v673_v12 = vpop.eup %672 }
 0x120   :  { %v292_v13 = vpop.f32.mrb[20].mxu0  ;;  %v600_v14 = vpack.c.bf16 %v673_v12, %v671_v11 }
 0x121   :  { %v293_v15 = vadd.f32 %v819_v34, %v292_v13  ;;  %v294_v16 = vpop.f32.mrb[21].mxu0 }
 0x122   :  { %v295_v17 = vpop.f32.mrb[22].mxu0  ;;  %602 = vmatpush3.bf16.xpose.msk.msra.mxu1 %vm827_vm5, %v600_v14 }
 0x123   :  { %v296_v18 = vadd.f32 %v819_v34, %v295_v17  ;;  %v297_v19 = vpop.f32.mrb[23].mxu0  ;;  %603 = vmatprep.subr.bf16.mxu1 %v696_v30  ;;  %678 = vtanh.f32 %v293_v15 }
 0x125   :  { %680 = vtanh.f32 %v296_v18  ;;  %v675_v20 = vpop.eup %674 }
 0x127   :  { %v677_v21 = vpop.eup %676 }
 0x128   :  { %v300_v22 = vpop.f32.mrb[24].mxu0  ;;  %v604_v23 = vpack.c.bf16 %v677_v21, %v675_v20 }
 0x129   :  { %v301_v24 = vadd.f32 %v819_v34, %v300_v22  ;;  %v302_v25 = vpop.f32.mrb[25].mxu0 }
 0x12a   :  { %v303_v26 = vpop.f32.mrb[26].mxu0  ;;  %606 = vmatpush3.bf16.xpose.msk.msra.mxu1 %vm827_vm5, %v604_v23 }
 0x12b   :  { %v304_v27 = vadd.f32 %v819_v34, %v303_v26  ;;  %v305_v28 = vpop.f32.mrb[27].mxu0  ;;  %607 = vmatprep.subr.bf16.mxu1 %v696_v30  ;;  %682 = vtanh.f32 %v301_v24 }
 0x12d   :  { %684 = vtanh.f32 %v304_v27  ;;  %v679_v29 = vpop.eup %678 }
 0x12f   :  { %v681_v31 = vpop.eup %680 }
 0x130   :  { %v308_v32 = vpop.f32.mrb[28].mxu0  ;;  %v608_v33 = vpack.c.bf16 %v681_v31, %v679_v29 }
 0x131   :  { %v309_v35 = vadd.f32 %v819_v34, %v308_v32  ;;  %v310_v36 = vpop.f32.mrb[29].mxu0 }
 0x132   :  { %v311_v37 = vpop.f32.mrb[30].mxu0  ;;  %610 = vmatpush3.bf16.xpose.msk.msra.mxu1 %vm827_vm5, %v608_v33 }
 0x133   :  { %v312_v38 = vadd.f32 %v819_v34, %v311_v37  ;;  %v313_v39 = vpop.f32.mrb[31].mxu0  ;;  %611 = vmatprep.subr.bf16.mxu1 %v696_v30  ;;  %686 = vtanh.f32 %v309_v35  ;;  %v331_v34 = vld [vmem:[%s880_s3] sm:$0x1] }
 0x135   :  { %688 = vtanh.f32 %v312_v38  ;;  %v683_v40 = vpop.eup %682 }
 0x137   :  { %v685_v41 = vpop.eup %684 }
 0x138   :  { %v612_v42 = vpack.c.bf16 %v685_v41, %v683_v40 }
 0x13a   :  { %614 = vmatpush3.bf16.xpose.msk.msra.mxu1 %vm827_vm5, %v612_v42 }
 0x13b   :  { %615 = vmatprep.subr.bf16.mxu1 %v696_v30 }
 0x13d   :  { %v687_v43 = vpop.eup %686 }
 0x13f   :  { %v689_v44 = vpop.eup %688 }
 0x140   :  { %v616_v45 = vpack.c.bf16 %v689_v44, %v687_v43 }
 0x142   :  { %618 = vmatpush3.bf16.xpose.msk.msra.mxu1 %vm827_vm5, %v616_v45 }
 0x149   :  { %585 = vmatmul.mubr.msk.f32.vlgmr.msra.gmra.mrb[0].mxu1 %vm342_vm4, %v331_v34 }
 0x21c   :  { %v460_v52 = vpop.f32.mrb[0].mxu1 }
 0x21d   :  { %v461_v53 = vadd.f32 %v460_v52, %v341_v51  ;;  %v586_v30 = vpop.f32.mrb[1].mxu1 }
 0x21f   :  { %v464_v54 = vand.u32 2147483647, %v461_v53  ;;  %v475_v58 = vsub.f32 0.0, %v461_v53  ;;  %v471_v61 = vmax.f32 %v461_v53, 0.0 }
 0x221   :  { %v465_v55 = vsub.f32 0.0, %v464_v54  ;;  %v476_v62 = vmax.f32 %v475_v58, 0.0 }
 0x223   :  { %v466_v56 = vmul.f32 1.442695, %v465_v55 }
 0x225   :  { %690 = vpow2.f32 %v466_v56 }
 0x22f   :  { %v691_v49 = vpop.eup %690 }
 0x230   :  { %v468_v57 = vadd.f32 1.0, %v691_v49 }
 0x232   :  { %692 = vlog2.f32 %v468_v57 }
 0x23c   :  { %v693_v59 = vpop.eup %692 }
 0x23d   :  { %v470_v60 = vmul.f32 0.6931472, %v693_v59 }
 0x23f   :  { %v472_v63 = vadd.f32 %v471_v61, %v470_v60  ;;  %v477_v0 = vadd.f32 %v476_v62, %v470_v60 }
 0x241   :  { %v473_v1 = vsub.f32 0.0, %v472_v63  ;;  %v478_v2 = vsub.f32 0.0, %v477_v0 }
 0x243   :  { %474 = vst [vmem:[%s881_s5] sm:$0x1] %v473_v1  ;;  %479 = vst [vmem:[%s881_s5 + $0x1] sm:$0x1] %v478_v2 }

</bundles_post_ra>
